<compile_context>
chip_gen: v7x
topology: tpu7x:2x2x1
jax: 0.10.0
libtpu: 0.0.40
codegen_flags: <defaults>
</compile_context>

<pallas_src>
import math

import jax
import jax.numpy as jnp
from jax.experimental import pallas as pl
from jax.experimental.pallas import tpu as pltpu

_TWO_PI = 2.0 * math.pi
_HALF_PI = 0.5 * math.pi


def _round_up(n, m):
    return ((n + m - 1) // m) * m


def _cdiv(a, b):
    return (a + b - 1) // b


def _posemb_kernel(x_ref, wrow_ref, phase_ref, xsel_ref, o_ref):
    # x_ref:     (TILE_B, 1) f32   timesteps column
    # wrow_ref:  (1, W) f32        2*pi * [0 | w | w]
    # phase_ref: (1, W) f32        [0 | 0...0 | pi/2...pi/2]   (cos t = sin(t + pi/2))
    # xsel_ref:  (1, W) f32        [1 | 0 ... 0]                (x pass-through lane)
    # o_ref:     (TILE_B, W) f32   [x | sin(2*pi*x*w) | cos(2*pi*x*w)]
    x = x_ref[...]                                     # (TILE_B, 1)
    theta = x * wrow_ref[...] + phase_ref[...]         # (TILE_B, W) broadcast outer product (VPU)
    # Lane 0: theta == 0 -> sin(0) == 0, so adding x * e0 injects the raw x column.
    o_ref[...] = (jnp.sin(theta) + x * xsel_ref[...]).astype(o_ref.dtype)


def _jnp_reference(x, weights):
    x32 = x.astype(jnp.float32)
    w32 = weights.astype(jnp.float32)
    freqs = x32[:, None] * w32[None, :] * _TWO_PI
    return jnp.concatenate([x32[:, None], jnp.sin(freqs), jnp.cos(freqs)], axis=-1)


def random_or_learned_sinusoidal_pos_emb(x, weights, *, tile_b=1024, use_pallas=None):
    """x: (B,), weights: (half_dim,) -> (B, 1 + 2*half_dim) float32.

    Matches PyTorch RandomOrLearnedSinusoidalPosEmb.forward: [x | sin(2*pi*x*w) | cos(2*pi*x*w)].
    """
    assert x.ndim == 1 and weights.ndim == 1
    B = x.shape[0]
    H = weights.shape[0]
    W = 1 + 2 * H

    if use_pallas is None:
        # Only worth a kernel launch once the output is multiple MiB; otherwise let XLA fuse.
        use_pallas = (B * W * 4) >= (4 << 20)
    if not use_pallas:
        return _jnp_reference(x, weights)

    x32 = x.astype(jnp.float32)
    w32 = weights.astype(jnp.float32)

    # Tiny O(H) wrapper-side prep of the resident rows.
    zero1 = jnp.zeros((1,), jnp.float32)
    wrow = (_TWO_PI * jnp.concatenate([zero1, w32, w32]))[None, :]                 # (1, W)
    phase = jnp.concatenate([jnp.zeros((1 + H,), jnp.float32),
                             jnp.full((H,), _HALF_PI, jnp.float32)])[None, :]      # (1, W)
    xsel = jnp.concatenate([jnp.ones((1,), jnp.float32),
                            jnp.zeros((2 * H,), jnp.float32)])[None, :]            # (1, W)

    # Balanced batch tiling: >= 2 tiles once B >= 16 (v7x megacore), tiles a multiple
    # of 8 sublanes, capped by an ~8 MiB double-buffered output budget
    # (safe on v5e's 16 MiB scoped VMEM and v7x's 64 MiB physical / 2 cores).
    vmem_budget = 8 << 20
    tile_cap = max(8, (vmem_budget // (W * 4 * 2)) // 8 * 8)
    desired_tiles = max(_cdiv(B, tile_b), 2 if B >= 16 else 1)
    tile_rows = _round_up(_cdiv(B, desired_tiles), 8)
    tile_rows = max(8, min(tile_rows, tile_cap))
    num_tiles = _cdiv(B, tile_rows)
    b_pad = num_tiles * tile_rows

    x_col = x32[:, None]
    if b_pad != B:
        x_col = jnp.zeros((b_pad, 1), jnp.float32).at[:B].set(x_col)

    cost = pl.CostEstimate(
        flops=25 * b_pad * W,            # sin polynomial (~20 VPU flops/elem) + mul/add
        transcendentals=b_pad * W,
        bytes_accessed=4 * (b_pad + 3 * W + b_pad * W),
    )

    out = pl.pallas_call(
        _posemb_kernel,
        out_shape=jax.ShapeDtypeStruct((b_pad, W), jnp.float32),
        grid=(num_tiles,),
        in_specs=[
            pl.BlockSpec((tile_rows, 1), lambda i: (i, 0)),   # x tile marches over the batch
            pl.BlockSpec((1, W), lambda i: (0, 0)),           # scaled weights stay resident
            pl.BlockSpec((1, W), lambda i: (0, 0)),           # phase row stays resident
            pl.BlockSpec((1, W), lambda i: (0, 0)),           # x-select one-hot stays resident
        ],
        out_specs=pl.BlockSpec((tile_rows, W), lambda i: (i, 0)),
        compiler_params=pltpu.CompilerParams(
            dimension_semantics=("parallel",),
        ),
        cost_estimate=cost,
    )(x_col, wrow, phase, xsel)

    if b_pad != B:
        out = out[:B]
    return out


if __name__ == "__main__":
    key = jax.random.PRNGKey(0)
    k_x, k_w = jax.random.split(key)

    dim = 32                     # module arg; must be even
    half_dim = dim // 2
    B = 8

    # Deterministic "parameter" init (same shape as nn.Parameter(torch.randn(half_dim)))
    weights = jax.random.normal(k_w, (half_dim,), dtype=jnp.float32)
    # Input: a batch of scalar timesteps (shape (B,))
    x = jax.random.normal(k_x, (B,), dtype=jnp.float32)

    # Force the Pallas path even at demo size (auto policy would pick plain jnp here).
    out = random_or_learned_sinusoidal_pos_emb(x, weights, use_pallas=True)
    out = jax.block_until_ready(out)

    ref = _jnp_reference(x, weights)
    assert out.shape == (B, dim + 1), out.shape
    # cos realized as sin(theta + pi/2): within a few ulp of direct cos.
    assert jnp.allclose(out, ref, atol=5e-5), float(jnp.max(jnp.abs(out - ref)))

    print("KERNEL_OK")
</pallas_src>

<mosaic_0001>
module attributes {stable_mosaic.version = 11 : i64} {
  func.func @_posemb_kernel(%arg0: i32, %arg1: memref<8x1xf32, #tpu.memory_space<vmem>>, %arg2: memref<1x33xf32, #tpu.memory_space<vmem>>, %arg3: memref<1x33xf32, #tpu.memory_space<vmem>>, %arg4: memref<1x33xf32, #tpu.memory_space<vmem>>, %arg5: memref<8x33xf32, #tpu.memory_space<vmem>>) attributes {dimension_semantics = [#tpu.dimension_semantics<parallel>], iteration_bounds = array<i64: 1>, scalar_prefetch = 0 : i64, scratch_operands = 0 : i64, tpu.core_type = #tpu.core_type<tc>, window_params = [{transform_indices = @transform_0, window_bounds = array<i64: 8, 1>}, {pipeline_mode = #tpu.pipeline_mode<synchronous>, transform_indices = @transform_1, window_bounds = array<i64: 1, 33>}, {pipeline_mode = #tpu.pipeline_mode<synchronous>, transform_indices = @transform_2, window_bounds = array<i64: 1, 33>}, {pipeline_mode = #tpu.pipeline_mode<synchronous>, transform_indices = @transform_3, window_bounds = array<i64: 1, 33>}, {transform_indices = @transform_4, window_bounds = array<i64: 8, 33>}]} {
    %c0 = arith.constant 0 : index
    %c0_0 = arith.constant 0 : index
    %0 = vector.load %arg1[%c0, %c0_0] : memref<8x1xf32, #tpu.memory_space<vmem>>, vector<8x1xf32>
    %c0_1 = arith.constant 0 : index
    %c0_2 = arith.constant 0 : index
    %1 = vector.load %arg2[%c0_1, %c0_2] : memref<1x33xf32, #tpu.memory_space<vmem>>, vector<1x33xf32>
    %2 = vector.broadcast %0 : vector<8x1xf32> to vector<8x33xf32>
    %3 = vector.broadcast %1 : vector<1x33xf32> to vector<8x33xf32>
    %4 = arith.mulf %2, %3 : vector<8x33xf32>
    %c0_3 = arith.constant 0 : index
    %c0_4 = arith.constant 0 : index
    %5 = vector.load %arg3[%c0_3, %c0_4] : memref<1x33xf32, #tpu.memory_space<vmem>>, vector<1x33xf32>
    %6 = vector.broadcast %5 : vector<1x33xf32> to vector<8x33xf32>
    %7 = arith.addf %4, %6 : vector<8x33xf32>
    %8 = math.sin %7 : vector<8x33xf32>
    %c0_5 = arith.constant 0 : index
    %c0_6 = arith.constant 0 : index
    %9 = vector.load %arg4[%c0_5, %c0_6] : memref<1x33xf32, #tpu.memory_space<vmem>>, vector<1x33xf32>
    %10 = vector.broadcast %0 : vector<8x1xf32> to vector<8x33xf32>
    %11 = vector.broadcast %9 : vector<1x33xf32> to vector<8x33xf32>
    %12 = arith.mulf %10, %11 : vector<8x33xf32>
    %13 = arith.addf %8, %12 : vector<8x33xf32>
    %c0_7 = arith.constant 0 : index
    %c0_8 = arith.constant 0 : index
    %14 = vector.load %arg5[%c0_7, %c0_8] : memref<8x33xf32, #tpu.memory_space<vmem>>, vector<8x33xf32>
    tpu.vector_store %arg5[%c0_7, %c0_8], %13 {strides = array<i32>} : memref<8x33xf32, #tpu.memory_space<vmem>>, vector<8x33xf32>,
    return
  }
  func.func @transform_0(%arg0: i32) -> (i32, i32) {
    %c0_i32 = arith.constant 0 : i32
    %c0_i32_0 = arith.constant 0 : i32
    return %arg0, %c0_i32 : i32, i32
  }
  func.func @transform_1(%arg0: i32) -> (i32, i32) {
    %c0_i32 = arith.constant 0 : i32
    %c0_i32_0 = arith.constant 0 : i32
    %c0_i32_1 = arith.constant 0 : i32
    return %c0_i32, %c0_i32_0 : i32, i32
  }
  func.func @transform_2(%arg0: i32) -> (i32, i32) {
    %c0_i32 = arith.constant 0 : i32
    %c0_i32_0 = arith.constant 0 : i32
    %c0_i32_1 = arith.constant 0 : i32
    return %c0_i32, %c0_i32_0 : i32, i32
  }
  func.func @transform_3(%arg0: i32) -> (i32, i32) {
    %c0_i32 = arith.constant 0 : i32
    %c0_i32_0 = arith.constant 0 : i32
    %c0_i32_1 = arith.constant 0 : i32
    return %c0_i32, %c0_i32_0 : i32, i32
  }
  func.func @transform_4(%arg0: i32) -> (i32, i32) {
    %c0_i32 = arith.constant 0 : i32
    %c0_i32_0 = arith.constant 0 : i32
    return %arg0, %c0_i32 : i32, i32
  }
}

</mosaic_0001>

<bundles_post_ra>
// kernel: tpu_custom_call.1
= control target key start
LH: loop header
LB: loop body
LE: loop exit
PB: predicated region body
PF: predicated region fallthrough
CT: control target
= control target key end

     0   :  { %v217_v1 = vmov 0   ;;  %s299_s0 = inlined_call_operand.vmem [shape: f32[8,1], index: 0, kind: input, shape index: {}]   ;;  %s300_s1 = inlined_call_operand.vmem [shape: f32[1,33], index: 1, kind: input, shape index: {}]   ;;  %s301_s2 = inlined_call_operand.vmem [shape: f32[1,33], index: 2, kind: input, shape index: {}]   ;;  %s302_s3 = inlined_call_operand.vmem [shape: f32[1,33], index: 3, kind: input, shape index: {}]   ;;  %s303_s4 = inlined_call_operand.hbm [shape: f32[8,33], index: 4, kind: output, shape index: {}]  }
   0x1   :  { %v18_v0 = vld [vmem:[%s299_s0] sm:$0xff]  ;;  %188 = vset.pattern.permute.xlu0 %v217_v1 }
   0x2   :  { %22 = vperm.xlu0 %188, %v18_v0  }
   0x3   :  { %9 = vsyncpa [#allocation3], 0  ;;  %v169_v2 = vld [vmem:[%s300_s1] ss:$0 sm:$0xff]  ;;  %v218_v17 = vmov 683565275  }
   0x4   :  { %v170_v3 = vld [vmem:[%s301_s2] ss:$0 sm:$0xff]  ;;  %v219_v19 = vmov 2475754826   ;;  %v220_v22 = vmov 2131351028  }
   0x5   :  { %v221_v25 = vmov 2102212464   ;;  %v222_v28 = vmov 920167782   ;;  %v223_v31 = vmov 1326507024  }
   0x6   :  { %s224_s2 = smov [#allocation2]   ;;  %vm153_vm13 = vcmask 269312  }
   0x7   :  { %s161_s21 = sshll.u32 %s224_s2, 4  ;;  %s162_s21 = int_to_ptr.vmem [resolvable:$true] %s161_s21 }
   0x8   :  { %s193_s22 = scalar_lea.vmem %s162_s21, 128  ;;  %p198_p1 = scmp.lt.s32.totalorder %s162_s21, %s162_s21 }
   0x9   :  { %p194_p0 = scmp.ne.s32.totalorder %s162_s21, %s193_s22  ;;  %p199_p2 = scmp.lt.s32.totalorder %s193_s22, %s193_s22 }
   0xb   :  { %p200_p3 = por %p199_p2, %p198_p1 }
   0xd   :  { %p201_p4 = pnand %p200_p3, %p194_p0 }
  0x81   :  { %v259_v4 = vpop.permute.xlu0 %22 }
  0x82   :  { %v31_v5 = vmul.f32 %v169_v2, %v259_v4 }
  0x84   :  { %v262_v6 = vadd.f32 %v170_v3, %v31_v5 }
  0x86   :  { %v43_v7 = vand.u32 2139095040, %v262_v6  ;;  %v40_v11 = vand.u32 2147483647, %v262_v6  ;;  %vm42_vm7 = vcmp.lt.s32.totalorder %v262_v6, 0  ;;  %vm132_vm12 = vweird.f32 %v262_v6 }
  0x88   :  { %v44_v8 = vshrl.u32 %v43_v7, 23  ;;  %v47_v14 = vand.u32 8388607, %v40_v11  ;;  %vm41_vm8 = vcmp.le.f32.partialorder %v40_v11, 0.7853982 }
  0x8a   :  { %v171_v9 = vadd.s32 4294967169, %v44_v8  ;;  %v48_v33 = vor.u32 8388608, %v47_v14 }
  0x8c   :  { %v50_v10 = vadd.s32 1, %v171_v9  ;;  %v88_v47 = vshll.u32 %v48_v33, 8 }
  0x8e   :  { %vm51_vm0 = vcmp.gt.s32.totalorder %v50_v10, 0 }
  0x8f   :  { %v52_v12 = vsel %vm51_vm0, %v50_v10, 0 }
  0x90   :  { %v54_v13 = vand.u32 31, %v52_v12  ;;  %v53_v16 = vshrl.u32 %v52_v12, 5 }
  0x92   :  { %v55_v15 = vsub.s32 32, %v54_v13  ;;  %v57_v18 = vshll.u32 %v218_v17, %v54_v13  ;;  %v60_v20 = vshll.u32 %v219_v19, %v54_v13  ;;  %v63_v24 = vshll.u32 %v220_v22, %v54_v13 }
  0x93   :  { %v66_v27 = vshll.u32 %v221_v25, %v54_v13  ;;  %v69_v30 = vshll.u32 %v222_v28, %v54_v13  ;;  %vm72_vm1 = vcmp.lt.s32.totalorder %v53_v16, 1  ;;  %vm75_vm2 = vcmp.lt.s32.totalorder %v53_v16, 4 }
  0x94   :  { %v58_v21 = vshrl.u32 %v219_v19, %v55_v15  ;;  %v61_v23 = vshrl.u32 %v220_v22, %v55_v15  ;;  %v64_v26 = vshrl.u32 %v221_v25, %v55_v15  ;;  %v67_v29 = vshrl.u32 %v222_v28, %v55_v15 }
  0x95   :  { %v70_v32 = vshrl.u32 %v223_v31, %v55_v15  ;;  %v56_v42 = vshrl.u32 %v218_v17, %v55_v15  ;;  %vm74_vm3 = vcmp.lt.s32.totalorder %v53_v16, 3  ;;  %vm73_vm4 = vcmp.lt.s32.totalorder %v53_v16, 2 }
  0x96   :  { %v59_v34 = vor.u32 %v58_v21, %v57_v18  ;;  %v62_v35 = vor.u32 %v61_v23, %v60_v20  ;;  %v65_v36 = vor.u32 %v64_v26, %v63_v24  ;;  %v68_v37 = vor.u32 %v67_v29, %v66_v27 }
  0x97   :  { %v71_v38 = vor.u32 %v70_v32, %v69_v30  ;;  %v175_v32 = vld [vmem:[%s302_s3] ss:$0 sm:$0xff] }
  0x98   :  { %v77_v39 = vsel %vm75_vm2, %v65_v36, 2102212464  ;;  %v80_v40 = vsel %vm72_vm1, %v59_v34, %v62_v35  ;;  %v84_v41 = vsel %vm72_vm1, %v62_v35, %v65_v36  ;;  %v81_v43 = vsel %vm75_vm2, %v68_v37, 920167782 }
  0x99   :  { %v85_v44 = vsel %vm75_vm2, %v71_v38, 1326507024  ;;  %v82_v45 = vsel %vm74_vm3, %v65_v36, %v81_v43  ;;  %v76_v48 = vsel %vm72_vm1, %v56_v42, %v59_v34  ;;  %v78_v49 = vsel %vm74_vm3, %v62_v35, %v77_v39 }
  0x9a   :  { %v86_v46 = vsel %vm74_vm3, %v68_v37, %v85_v44  ;;  %v83_v50 = vsel %vm73_vm4, %v80_v40, %v82_v45  ;;  %v79_v56 = vsel %vm73_vm4, %v76_v48, %v78_v49  ;;  %v151_v36 = vmul.f32 %v175_v32, %v259_v4 }
  0x9b   :  { %v87_v51 = vsel %vm73_vm4, %v84_v41, %v86_v46  ;;  %v271_v54 = vmul.u32.u64.low %v88_v47, %v83_v50  ;;  %v272_v55 = vmul.u32.u64.high %v88_v47, %v83_v50, %v271_v54  ;;  %v95_v58 = vmul.u32 %v88_v47, %v79_v56 }
  0x9c   :  { %v268_v52 = vmul.u32.u64.low %v88_v47, %v87_v51  ;;  %v269_v53 = vmul.u32.u64.high %v88_v47, %v87_v51, %v268_v52 }
  0x9d   :  { %v98_v57 = vadd.s32 1, %v272_v55 }
  0x9e   :  { %vm97_vm5 = vc.u32 %v269_v53, %v271_v54  ;;  %v96_v8 = vadd.s32 %v271_v54, %v269_v53 }
  0x9f   :  { %v99_v59 = vsel %vm97_vm5, %v98_v57, %v272_v55 }
  0xa0   :  { %v100_v60 = vadd.s32 %v99_v59, %v95_v58 }
  0xa2   :  { %v101_v61 = vadd.s32 536870912, %v100_v60 }
  0xa4   :  { %v102_v62 = vshrl.u32 %v101_v61, 30 }
  0xa6   :  { %v103_v63 = vshll.u32 %v102_v62, 30  ;;  %v126_v21 = vsub.s32 4, %v102_v62 }
  0xa8   :  { %v104_v0 = vsub.s32 %v100_v60, %v103_v63  ;;  %v127_v24 = vsel %vm42_vm7, %v126_v21, %v102_v62 }
  0xa9   :  { %v129_v26 = vsel %vm41_vm8, 0, %v127_v24 }
  0xaa   :  { %v106_v1 = vsub.s32 0, %v104_v0  ;;  %v133_v27 = vadd.s32 3, %v129_v26 }
  0xac   :  { %v172_v2 = vmin.u32 %v106_v1, %v104_v0  ;;  %v134_v28 = vand.u32 3, %v133_v27 }
  0xae   :  { %v108_v3 = vclz %v172_v2  ;;  %vm139_vm9 = vcmp.eq.s32.totalorder %v134_v28, 2  ;;  %vm136_vm10 = vcmp.eq.s32.totalorder %v134_v28, 0  ;;  %vm135_vm11 = vcmp.lt.s32.totalorder %v134_v28, 2 }
  0xb0   :  { %v173_v5 = vadd.s32 4294967294, %v108_v3 }
  0xb2   :  { %vm174_vm6 = vcmp.lt.s32.totalorder %v173_v5, 0 }
  0xb3   :  { %v111_v7 = vsel %vm174_vm6, 0, %v173_v5 }
  0xb4   :  { %v112_v9 = vsub.s32 32, %v111_v7  ;;  %v116_v10 = vsub.s32 4294967266, %v111_v7  ;;  %v113_v12 = vshll.u32 %v104_v0, %v111_v7 }
  0xb6   :  { %v114_v13 = vshrl.u32 %v96_v8, %v112_v9  ;;  %v117_v14 = vadd.s32 127, %v116_v10 }
  0xb8   :  { %v115_v15 = vor.u32 %v114_v13, %v113_v12  ;;  %v118_v16 = vshll.u32 %v117_v14, 23 }
  0xba   :  { %v119_v17 = vor.u32 4788187, %v118_v16  ;;  %v122_v19 = vcvt.s32.f32 %v115_v15 }
  0xbc   :  { %v120_v18 = vand.u32 2147483647, %v119_v17 }
  0xbe   :  { %v123_v20 = vmul.f32 %v122_v19, %v120_v18 }
  0xc0   :  { %v124_v22 = vxor.u32 2147483648, %v123_v20 }
  0xc2   :  { %v125_v23 = vsel %vm42_vm7, %v124_v22, %v123_v20 }
  0xc3   :  { %v128_v25 = vsel %vm41_vm8, %v262_v6, %v125_v23 }
  0xc4   :  { %189 = vcosq.f32 %v128_v25 }
  0xc5   :  { %191 = vsinq.f32 %v128_v25 }
  0xce   :  { %v190_v29 = vpop.eup %189 }
  0xcf   :  { %v192_v30 = vpop.eup %191  ;;  %v140_v31 = vxor.u32 2147483648, %v190_v29 }
  0xd0   :  { %v137_v33 = vxor.u32 2147483648, %v192_v30 }
  0xd1   :  { %v141_v11 = vsel %vm139_vm9, %v140_v31, %v192_v30 }
  0xd2   :  { %v138_v34 = vsel %vm136_vm10, %v190_v29, %v137_v33 }
  0xd3   :  { %v142_v35 = vsel %vm135_vm11, %v138_v34, %v141_v11 }
  0xd4   :  { %v143_v37 = vsel %vm132_vm12, nan, %v142_v35 }
  0xd5   :  { %v152_v38 = vadd.f32 %v151_v36, %v143_v37 }
  0xd7   :  { %154 = vst.msk [vmem:[#allocation2] sm:$0xff] %vm153_vm13, %v152_v38 }
  0xd8   :  { %204 = shalt.err (!%p201_p4)
}
  0xd9   :  { %s205_s24 = scalar_lea.hbm %s303_s4, 128 }
  0xda   :  { %p206_p5 = scmp.ne.s32.totalorder %s303_s4, %s205_s24  ;;  %p209_p6 = scmp.lt.u32.totalorder %s205_s24, %s303_s4 }
  0xdc   :  { %p211_p7 = pnand %p209_p6, %p206_p5 }
  0xde   :  { %214 = shalt.err (!%p211_p7)
}
  0xdf   :  { %164 = dma.vmem_to_hbm [thread:$0]  %s162_s21, 128, %s303_s4, [#allocation3]  }
  0xe0   :  { %215 = dma.done.wait [#allocation3], 128  }
  0xe1   :  { %216 = vsyncadd [#allocation3], 4294967168 }
  0xe2   :  { %168 = vsyncpa [#allocation3], 1 }

</bundles_post_ra>
